<compile_context>
chip_gen: v6e
topology: v6e:2x2x1
jax: 0.10.0
libtpu: 0.0.40
codegen_flags: <defaults>
</compile_context>

<pallas_src>
import functools

import jax
import jax.numpy as jnp
from jax import lax
from jax.experimental import pallas as pl
from jax.experimental.pallas import tpu as pltpu


def _round_up(x: int, m: int) -> int:
    return ((x + m - 1) // m) * m


def _linear_kernel(x_ref, w_ref, o_ref, acc_ref):
    # x_ref: (tm, tk), w_ref: (tn, tk), o_ref: (tm, tn), acc_ref: (tm, tn) f32
    k = pl.program_id(2)

    # Contract the K axis of both operands: (tm, tk) x (tn, tk) -> (tm, tn).
    partial = lax.dot_general(
        x_ref[...],
        w_ref[...],
        dimension_numbers=(((1,), (1,)), ((), ())),
        preferred_element_type=jnp.float32,
    )

    # First K-step writes directly (saves a full-tile zero store + reload);
    # later steps accumulate.
    @pl.when(k == 0)
    def _first():
        acc_ref[...] = partial

    @pl.when(k != 0)
    def _accum():
        acc_ref[...] += partial

    @pl.when(k == pl.num_programs(2) - 1)
    def _store():
        o_ref[...] = acc_ref[...].astype(o_ref.dtype)


@functools.partial(jax.jit, static_argnames=("block_m", "block_n", "block_k"))
def linear(x, weight, *, block_m: int = 512, block_n: int = 1024,
           block_k: int = 1024):
    """Pallas equivalent of `x @ weight.T` (torch nn.Linear forward, no bias).

    x:      (..., in_features)
    weight: (out_features, in_features)
    returns (..., out_features), dtype = promotion of x/weight dtypes.
    """
    *batch_shape, K = x.shape
    N, Kw = weight.shape
    assert K == Kw, f"in_features mismatch: x has {K}, weight has {Kw}"

    x2d = x.reshape(-1, K)
    M = x2d.shape[0]
    out_dtype = jnp.result_type(x.dtype, weight.dtype)

    # ---- tile selection -------------------------------------------------
    # A block dim is legal if it is a multiple of (8 sublane / 128 lane) OR
    # equals the full array dim.  Prefer "full dim" blocks (no padding pass).

    # K (reduction) tile.
    if K <= block_k:
        tk, Kp = K, K
    else:
        tk = block_k                      # multiple of 128
        Kp = _round_up(K, tk)

    # N (output features) tile.
    if N <= block_n:
        tn, Np = N, N
    else:
        tn = block_n                      # multiple of 128
        Np = _round_up(N, tn)

    # M (rows) tile: spread a ragged M over the minimum number of blocks so we
    # don't pad nearly a full tile of zero rows.
    if M <= block_m:
        tm, Mp = M, M
    else:
        n_m_blocks = -(-M // block_m)
        tm = _round_up(-(-M // n_m_blocks), 8)
        Mp = _round_up(M, tm)

    # v7x megacore: if M fits a single tile, give the parallel j (N) axis at
    # least 2 blocks when that introduces no padding, so both TCs get work.
    if Mp == tm and Np == tn and N >= 512 and N % 256 == 0:
        tn = N // 2                       # still a multiple of 128, Np == N

    # ---- padding (only when a dim actually spans multiple tiles) --------
    x_in = x2d
    if Mp != M or Kp != K:
        x_in = jnp.pad(x2d, ((0, Mp - M), (0, Kp - K)))
    w_in = weight
    if Np != N or Kp != K:
        w_in = jnp.pad(weight, ((0, Np - N), (0, Kp - K)))

    grid = (Mp // tm, Np // tn, Kp // tk)

    # ---- VMEM budget (dtype-correct, generation-aware cap) --------------
    x_item = jnp.dtype(x.dtype).itemsize
    w_item = jnp.dtype(weight.dtype).itemsize
    o_item = jnp.dtype(out_dtype).itemsize
    vmem_bytes = (
        2 * tm * tk * x_item      # double-buffered x tile
        + 2 * tn * tk * w_item    # double-buffered weight tile
        + 2 * tm * tn * o_item    # double-buffered output tile
        + tm * tn * 4             # f32 accumulator scratch
    )
    try:
        vmem_cap = int(pltpu.get_tpu_info().vmem_capacity_bytes)
    except Exception:
        vmem_cap = 64 << 20       # conservative (v7x per-TC) fallback
    vmem_limit = min(int(vmem_bytes * 1.5) + (2 << 20), vmem_cap - (12 << 20))
    vmem_limit = max(vmem_limit, min(16 << 20, vmem_cap // 2))

    out_p = pl.pallas_call(
        _linear_kernel,
        out_shape=jax.ShapeDtypeStruct((Mp, Np), out_dtype),
        grid_spec=pltpu.PrefetchScalarGridSpec(
            num_scalar_prefetch=0,
            grid=grid,
            in_specs=[
                pl.BlockSpec((tm, tk), lambda i, j, k: (i, k)),  # x tile
                pl.BlockSpec((tn, tk), lambda i, j, k: (j, k)),  # weight tile
            ],
            out_specs=pl.BlockSpec((tm, tn), lambda i, j, k: (i, j)),
            scratch_shapes=[pltpu.VMEM((tm, tn), jnp.float32)],
        ),
        compiler_params=pltpu.CompilerParams(
            dimension_semantics=("parallel", "parallel", "arbitrary"),
            vmem_limit_bytes=int(vmem_limit),
        ),
    )(x_in, w_in)

    if Mp != M or Np != N:
        out_p = out_p[:M, :N]
    return out_p.reshape(*batch_shape, N)


def init_linear_weight(key, in_features: int, out_features: int,
                       dtype=jnp.float32):
    """trunc_normal_(mean=0, std=sqrt(2/(in+out)), a=-3*std, b=3*std)."""
    std = (2.0 / (in_features + out_features)) ** 0.5
    w = jax.random.truncated_normal(
        key, lower=-3.0, upper=3.0, shape=(out_features, in_features))
    return (w * std).astype(dtype)


if __name__ == "__main__":
    key = jax.random.PRNGKey(0)
    k_w, k_x = jax.random.split(key)

    batch, seq = 2, 8
    in_features = 32
    out_features = 64

    weight = init_linear_weight(k_w, in_features, out_features)
    x = jax.random.normal(k_x, (batch, seq, in_features), dtype=jnp.float32)

    out = linear(x, weight)
    out = jax.block_until_ready(out)

    # Self-check against the plain-JAX reference.
    ref = jnp.einsum("bsi,oi->bso", x, weight)
    assert out.shape == (batch, seq, out_features)
    assert out.dtype == jnp.result_type(x.dtype, weight.dtype)
    assert jnp.allclose(out, ref, atol=1e-5, rtol=1e-5), "mismatch vs reference"

    print("KERNEL_OK")
</pallas_src>

<mosaic_0001>
module attributes {stable_mosaic.version = 11 : i64} {
  func.func @_linear_kernel(%arg0: i32, %arg1: i32, %arg2: i32, %arg3: memref<16x32xf32, #tpu.memory_space<vmem>>, %arg4: memref<64x32xf32, #tpu.memory_space<vmem>>, %arg5: memref<16x64xf32, #tpu.memory_space<vmem>>, %arg6: memref<16x64xf32, #tpu.memory_space<vmem>>) attributes {dimension_semantics = [#tpu.dimension_semantics<parallel>, #tpu.dimension_semantics<parallel>, #tpu.dimension_semantics<arbitrary>], iteration_bounds = array<i64: 1, 1, 1>, scalar_prefetch = 0 : i64, scratch_operands = 1 : i64, tpu.core_type = #tpu.core_type<tc>, window_params = [{transform_indices = @transform_0, window_bounds = array<i64: 16, 32>}, {transform_indices = @transform_1, window_bounds = array<i64: 64, 32>}, {transform_indices = @transform_2, window_bounds = array<i64: 16, 64>}]} {
    %c0 = arith.constant 0 : index
    %c0_0 = arith.constant 0 : index
    %0 = vector.load %arg3[%c0, %c0_0] : memref<16x32xf32, #tpu.memory_space<vmem>>, vector<16x32xf32>
    %c0_1 = arith.constant 0 : index
    %c0_2 = arith.constant 0 : index
    %1 = vector.load %arg4[%c0_1, %c0_2] : memref<64x32xf32, #tpu.memory_space<vmem>>, vector<64x32xf32>
    %cst = arith.constant dense<0.000000e+00> : vector<16x64xf32>
    %2 = tpu.matmul %0, %1, %cst {dimension_numbers = #tpu.dot_dimension_numbers<[1], [1], [0], [0], [0, 0, 1, 0], [], []>} : vector<16x32xf32>, vector<64x32xf32>, vector<16x64xf32> -> vector<16x64xf32>
    %c0_i32 = arith.constant 0 : i32
    %3 = arith.cmpi eq, %arg2, %c0_i32 : i32
    %4 = arith.extui %3 : i1 to i32
    %c0_i32_3 = arith.constant 0 : i32
    %5 = arith.cmpi ne, %4, %c0_i32_3 : i32
    scf.if %5 {
      %c0_8 = arith.constant 0 : index
      %c0_9 = arith.constant 0 : index
      %12 = vector.load %arg6[%c0_8, %c0_9] : memref<16x64xf32, #tpu.memory_space<vmem>>, vector<16x64xf32>
      tpu.vector_store %arg6[%c0_8, %c0_9], %2 {strides = array<i32>} : memref<16x64xf32, #tpu.memory_space<vmem>>, vector<16x64xf32>,
    } else {
    }
    %c0_i32_4 = arith.constant 0 : i32
    %6 = arith.cmpi ne, %arg2, %c0_i32_4 : i32
    %7 = arith.extui %6 : i1 to i32
    %c0_i32_5 = arith.constant 0 : i32
    %8 = arith.cmpi ne, %7, %c0_i32_5 : i32
    scf.if %8 {
      %c0_8 = arith.constant 0 : index
      %c0_9 = arith.constant 0 : index
      %12 = vector.load %arg6[%c0_8, %c0_9] : memref<16x64xf32, #tpu.memory_space<vmem>>, vector<16x64xf32>
      %13 = arith.addf %12, %2 : vector<16x64xf32>
      %c0_10 = arith.constant 0 : index
      %c0_11 = arith.constant 0 : index
      %14 = vector.load %arg6[%c0_10, %c0_11] : memref<16x64xf32, #tpu.memory_space<vmem>>, vector<16x64xf32>
      tpu.vector_store %arg6[%c0_10, %c0_11], %13 {strides = array<i32>} : memref<16x64xf32, #tpu.memory_space<vmem>>, vector<16x64xf32>,
    } else {
    }
    %c0_i32_6 = arith.constant 0 : i32
    %9 = arith.cmpi eq, %arg2, %c0_i32_6 : i32
    %10 = arith.extui %9 : i1 to i32
    %c0_i32_7 = arith.constant 0 : i32
    %11 = arith.cmpi ne, %10, %c0_i32_7 : i32
    scf.if %11 {
      %c0_8 = arith.constant 0 : index
      %c0_9 = arith.constant 0 : index
      %12 = vector.load %arg6[%c0_8, %c0_9] : memref<16x64xf32, #tpu.memory_space<vmem>>, vector<16x64xf32>
      %c0_10 = arith.constant 0 : index
      %c0_11 = arith.constant 0 : index
      %13 = vector.load %arg5[%c0_10, %c0_11] : memref<16x64xf32, #tpu.memory_space<vmem>>, vector<16x64xf32>
      tpu.vector_store %arg5[%c0_10, %c0_11], %12 {strides = array<i32>} : memref<16x64xf32, #tpu.memory_space<vmem>>, vector<16x64xf32>,
    } else {
    }
    return
  }
  func.func @transform_0(%arg0: i32, %arg1: i32, %arg2: i32) -> (i32, i32) {
    %c0_i32 = arith.constant 0 : i32
    return %arg0, %arg2 : i32, i32
  }
  func.func @transform_1(%arg0: i32, %arg1: i32, %arg2: i32) -> (i32, i32) {
    %c0_i32 = arith.constant 0 : i32
    return %arg1, %arg2 : i32, i32
  }
  func.func @transform_2(%arg0: i32, %arg1: i32, %arg2: i32) -> (i32, i32) {
    %c0_i32 = arith.constant 0 : i32
    return %arg0, %arg1 : i32, i32
  }
}

</mosaic_0001>

<bundles_post_ra>
// kernel: linear.1
= control target key start
LH: loop header
LB: loop body
LE: loop exit
PB: predicated region body
PF: predicated region fallthrough
CT: control target
= control target key end

     0   :  { %vm22_vm0 = vcmask 261120   ;;  %s303_s0 = inlined_call_operand.vmem [shape: f32[16,32], index: 0, kind: input, shape index: {}]   ;;  %s304_s1 = inlined_call_operand.vmem [shape: f32[64,32], index: 1, kind: input, shape index: {}]   ;;  %s305_s2 = inlined_call_operand.hbm [shape: f32[16,64], index: 2, kind: output, shape index: {}]  }
   0x1   :  { %v21_v0 = vld [vmem:[%s304_s1 + $0x38] sm:$0xff]  ;;  %v20_v1 = vld [vmem:[%s304_s1 + $0x30] sm:$0xff]  ;;  %v12_v2 = vld [vmem:[%s303_s0] sm:$0xff] }
   0x2   :  { %190 = vmatprep.subr.msk.mxu0 %vm22_vm0, %v21_v0  ;;  %206 = vmatprep.mubr.msk.f32.mxu0 %vm22_vm0, %v12_v2 }
   0x3   :  { %191 = vmatpush3.xpose.msk.msra.mxu0 %vm22_vm0, %v21_v0 }
   0x4   :  { %192 = vmatprep.subr.msk.mxu0 %vm22_vm0, %v20_v1 }
   0x5   :  { %7 = vsyncpa [#allocation4], 0  ;;  %v19_v3 = vld [vmem:[%s304_s1 + $0x28] sm:$0xff]  ;;  %v18_v4 = vld [vmem:[%s304_s1 + $0x20] sm:$0xff]  ;;  %vm132_vm1 = vcmask 523264   ;;  %s234_s29 = smov [#allocation3]  }
   0x6   :  { %v17_v5 = vld [vmem:[%s304_s1 + $0x18] sm:$0xff]  ;;  %v16_v6 = vld [vmem:[%s304_s1 + $0x10] sm:$0xff]  ;;  %v15_v7 = vld [vmem:[%s304_s1 + $0x8] sm:$0xff]  ;;  %s159_s30 = sshll.u32 %s234_s29, 4  ;;  %s160_s30 = int_to_ptr.vmem [resolvable:$true] %s159_s30 }
   0x7   :  { %193 = vmatpush3.xpose.msk.msra.mxu0 %vm22_vm0, %v20_v1  ;;  %v14_v8 = vld [vmem:[%s304_s1] sm:$0xff]  ;;  %v13_v9 = vld [vmem:[%s303_s0 + $0x8] sm:$0xff]  ;;  %s212_s1 = scalar_lea.vmem %s160_s30, 256  ;;  %p217_p1 = scmp.lt.s32.totalorder %s160_s30, %s160_s30 }
   0x8   :  { %194 = vmatprep.subr.msk.mxu0 %vm22_vm0, %v19_v3  ;;  %p213_p0 = scmp.ne.s32.totalorder %s160_s30, %s212_s1  ;;  %p218_p2 = scmp.lt.s32.totalorder %s212_s1, %s212_s1 }
   0xa   :  { %p219_p3 = por %p218_p2, %p217_p1 }
   0xb   :  { %195 = vmatpush3.xpose.msk.msra.mxu0 %vm22_vm0, %v19_v3 }
   0xc   :  { %196 = vmatprep.subr.msk.mxu0 %vm22_vm0, %v18_v4  ;;  %p220_p4 = pnand %p219_p3, %p213_p0 }
   0xf   :  { %197 = vmatpush3.xpose.msk.msra.mxu0 %vm22_vm0, %v18_v4 }
  0x10   :  { %198 = vmatprep.subr.msk.mxu0 %vm22_vm0, %v17_v5 }
  0x13   :  { %199 = vmatpush3.xpose.msk.msra.mxu0 %vm22_vm0, %v17_v5 }
  0x14   :  { %200 = vmatprep.subr.msk.mxu0 %vm22_vm0, %v16_v6 }
  0x17   :  { %201 = vmatpush3.xpose.msk.msra.mxu0 %vm22_vm0, %v16_v6 }
  0x18   :  { %202 = vmatprep.subr.msk.mxu0 %vm22_vm0, %v15_v7 }
  0x1b   :  { %203 = vmatpush3.xpose.msk.msra.mxu0 %vm22_vm0, %v15_v7 }
  0x1c   :  { %204 = vmatprep.subr.msk.mxu0 %vm22_vm0, %v14_v8 }
  0x1f   :  { %205 = vmatpush3.xpose.msk.msra.mxu0 %vm22_vm0, %v14_v8 }
  0x22   :  { %207 = vmatmul.mubr.msk.f32.vlgmr.msra.gmra.mxu0 %vm22_vm0, %v13_v9 }
  0xe2   :  { %v208_v10 = vpop.f32.mrf.mxu0 }
  0xe3   :  { %134 = vst.msk [vmem:[#allocation2 + $0x8] sm:$0xff] %vm132_vm1, %v208_v10 }
  0xe4   :  { %v119_v11 = vpop.f32.mrf.mxu0 }
  0xe5   :  { %133 = vst.msk [vmem:[#allocation2] sm:$0xff] %vm132_vm1, %v119_v11 }
  0xea   :  { %v150_v12 = vld [vmem:[#allocation2 + $0x8] sm:$0xff] }
  0xeb   :  { %153 = vst.msk [vmem:[#allocation3 + $0x8] sm:$0xff] %vm132_vm1, %v150_v12 }
  0xec   :  { %v149_v13 = vld [vmem:[#allocation2] sm:$0xff] }
  0xed   :  { %152 = vst.msk [vmem:[#allocation3] sm:$0xff] %vm132_vm1, %v149_v13 }
  0xee   :  { %223 = shalt.err (!%p220_p4)
}
  0xef   :  { %s235_s0 = smov 128   ;;  %s236_s3 = smov 8  }
  0xf0   :  { %165 = dma.vmem_to_hbm [thread:$0]  %s160_s30, 256, %s305_s2, [#allocation4], %s235_s0, %s235_s0, %s236_s3  }
  0xf1   :  { %232 = dma.done.wait [#allocation4], 256  }
  0xf2   :  { %233 = vsyncadd [#allocation4], 4294967040 }
  0xf3   :  { %169 = vsyncpa [#allocation4], 1 }

</bundles_post_ra>
